<compile_context>
chip_gen: v5e
topology: v5e:2x2
jax: 0.10.0
libtpu: 0.0.40
codegen_flags: <defaults>
</compile_context>

<pallas_src>
import jax
import jax.numpy as jnp
from jax.experimental import pallas as pl
from jax.experimental.pallas import tpu as pltpu

MARGIN = 0.3

# Conservative, generation-safe budgets (v7x has only 64 MiB physical VMEM/TC).
_VMEM_LIMIT_BYTES = 48 * 1024 * 1024
_INPUT_BUFFER_BUDGET = 36 * 1024 * 1024  # 3 inputs x 2 pipeline buffers


def _triplet_ssq_kernel(a_ref, p_ref, n_ref, pos_ssq_ref, neg_ssq_ref):
    """Accumulate per-row sums of squares over the tiled feature (D) axis."""
    di = pl.program_id(1)  # reduction axis (last grid dim)

    @pl.when(di == 0)
    def _():
        pos_ssq_ref[...] = jnp.zeros_like(pos_ssq_ref)
        neg_ssq_ref[...] = jnp.zeros_like(neg_ssq_ref)

    # Upcast on load: inputs may be bf16 (half the HBM traffic); all math in f32.
    a = a_ref[...].astype(jnp.float32)            # [tb, td]
    dpos = a - p_ref[...].astype(jnp.float32)     # VPU
    dneg = a - n_ref[...].astype(jnp.float32)     # VPU

    # Cross-lane reductions go to the XLU (separate VLIW slot from the squares);
    # accumulate into the resident [tb,1] output tiles.
    pos_ssq_ref[...] += jnp.sum(dpos * dpos, axis=1, keepdims=True)
    neg_ssq_ref[...] += jnp.sum(dneg * dneg, axis=1, keepdims=True)


def _pick_tiles(B, D, itemsize):
    """Tile sizes for padded (B, D); B % 8 == 0 and D % 128 == 0 are assumed."""
    # Lane tile: largest power-of-two multiple of 128 that divides D.
    td = 128
    for c in (4096, 2048, 1024, 512, 256, 128):
        if D % c == 0:
            td = c
            break

    # Sublane tile: largest candidate dividing B that leaves >= 2 B-tiles so the
    # "parallel" axis shards across v7x's two TensorCores.  Min tile is 16 rows
    # for 2-byte dtypes, 8 rows for f32.
    min_tb = 16 if itemsize < 4 else 8
    tb = B  # single-tile fallback (full axis is always legal)
    for c in (512, 256, 128, 64, 32, 16, 8):
        if c < min_tb:
            break
        if B % c == 0 and B // c >= 2:
            tb = c
            break

    # Shrink until the double-buffered input payload fits the VMEM budget.
    def buf_bytes(tb_, td_):
        return 3 * 2 * tb_ * td_ * itemsize

    while buf_bytes(tb, td) > _INPUT_BUFFER_BUDGET and td > 128 and D % (td // 2) == 0:
        td //= 2
    while buf_bytes(tb, td) > _INPUT_BUFFER_BUDGET and tb > min_tb and B % (tb // 2) == 0:
        tb //= 2
    return tb, td


def triplet_loss(anchor, positive, negative, margin=MARGIN):
    """anchor/positive/negative: [B, D] float32 or bfloat16. Returns loss [B]."""
    assert anchor.shape == positive.shape == negative.shape
    B, D = anchor.shape
    itemsize = jnp.dtype(anchor.dtype).itemsize

    # Zero-pad to lane/sublane-aligned shapes: zeros contribute nothing to the
    # sums of squares; padded rows are sliced off after the kernel.
    pad_b = (-B) % 8
    pad_d = (-D) % 128
    if pad_b or pad_d:
        pad = ((0, pad_b), (0, pad_d))
        anchor = jnp.pad(anchor, pad)
        positive = jnp.pad(positive, pad)
        negative = jnp.pad(negative, pad)
    Bp, Dp = anchor.shape

    tb, td = _pick_tiles(Bp, Dp, itemsize)
    grid = (Bp // tb, Dp // td)

    in_spec = pl.BlockSpec((tb, td), lambda bi, di: (bi, di))
    # Same block index across the D axis -> resident accumulator tile.
    out_spec = pl.BlockSpec((tb, 1), lambda bi, di: (bi, 0))

    cost = pl.CostEstimate(
        flops=6 * Bp * Dp,
        transcendentals=0,
        bytes_accessed=3 * Bp * Dp * itemsize + 2 * Bp * 4,
    )

    pos_ssq, neg_ssq = pl.pallas_call(
        _triplet_ssq_kernel,
        out_shape=(
            jax.ShapeDtypeStruct((Bp, 1), jnp.float32),
            jax.ShapeDtypeStruct((Bp, 1), jnp.float32),
        ),
        grid_spec=pl.GridSpec(
            grid=grid,
            in_specs=[in_spec, in_spec, in_spec],
            out_specs=(out_spec, out_spec),
        ),
        compiler_params=pltpu.CompilerParams(
            dimension_semantics=("parallel", "arbitrary"),
            vmem_limit_bytes=_VMEM_LIMIT_BYTES,
        ),
        cost_estimate=cost,
    )(anchor, positive, negative)

    # Tiny O(B) epilogue (negligible vs the 3*B*D*itemsize bytes of HBM traffic).
    pos_dist = jnp.sqrt(jnp.sum(pos_ssq))        # scalar: sum over ALL elements
    neg_dist = jnp.sqrt(neg_ssq[:B, 0])          # [B] (drop padded rows)
    return jnp.maximum(pos_dist - neg_dist + margin, 0.0)


def _reference(anchor, positive, negative):
    a = anchor.astype(jnp.float32)
    p = positive.astype(jnp.float32)
    n = negative.astype(jnp.float32)
    pos_dist = jnp.sqrt(jnp.sum((a - p) ** 2))
    neg_dist = jnp.sqrt(jnp.sum((a - n) ** 2, axis=1))
    return jnp.maximum(pos_dist - neg_dist + MARGIN, 0.0)


if __name__ == "__main__":
    key = jax.random.PRNGKey(0)

    # 1) f32, aligned shapes (D spans two lane tiles -> exercises D accumulation).
    ka, kp, kn, key = jax.random.split(key, 4)
    B, D = 8, 256
    anchor = jax.random.normal(ka, (B, D), dtype=jnp.float32)
    positive = anchor + 0.05 * jax.random.normal(kp, (B, D), dtype=jnp.float32)
    negative = jax.random.normal(kn, (B, D), dtype=jnp.float32)
    loss = triplet_loss(anchor, positive, negative)
    jax.block_until_ready(loss)
    ref = _reference(anchor, positive, negative)
    assert loss.shape == (B,)
    assert jnp.allclose(loss, ref, atol=1e-4, rtol=1e-4), (loss, ref)

    # 2) f32, awkward shapes -> exercises the zero-padding path (pads to 16x256).
    ka, kp, kn, key = jax.random.split(key, 4)
    B2, D2 = 10, 200
    a2 = jax.random.normal(ka, (B2, D2), dtype=jnp.float32)
    p2 = a2 + 0.05 * jax.random.normal(kp, (B2, D2), dtype=jnp.float32)
    n2 = jax.random.normal(kn, (B2, D2), dtype=jnp.float32)
    loss2 = triplet_loss(a2, p2, n2)
    jax.block_until_ready(loss2)
    ref2 = _reference(a2, p2, n2)
    assert loss2.shape == (B2,)
    assert jnp.allclose(loss2, ref2, atol=1e-4, rtol=1e-4), (loss2, ref2)

    # 3) bf16 inputs (half the HBM traffic); f32 accumulation inside the kernel.
    ka, kp, kn, key = jax.random.split(key, 4)
    B3, D3 = 16, 256
    a3 = jax.random.normal(ka, (B3, D3), dtype=jnp.float32).astype(jnp.bfloat16)
    p3 = (a3.astype(jnp.float32)
          + 0.05 * jax.random.normal(kp, (B3, D3), dtype=jnp.float32)).astype(jnp.bfloat16)
    n3 = jax.random.normal(kn, (B3, D3), dtype=jnp.float32).astype(jnp.bfloat16)
    loss3 = triplet_loss(a3, p3, n3)
    jax.block_until_ready(loss3)
    ref3 = _reference(a3, p3, n3)  # reference on the same bf16-valued inputs, in f32
    assert loss3.shape == (B3,)
    assert jnp.allclose(loss3, ref3, atol=2e-2, rtol=2e-2), (loss3, ref3)

    print("KERNEL_OK")
</pallas_src>

<mosaic_0001>
module attributes {stable_mosaic.version = 11 : i64} {
  func.func @_triplet_ssq_kernel(%arg0: i32, %arg1: i32, %arg2: memref<8x256xf32, #tpu.memory_space<vmem>>, %arg3: memref<8x256xf32, #tpu.memory_space<vmem>>, %arg4: memref<8x256xf32, #tpu.memory_space<vmem>>, %arg5: memref<8x1xf32, #tpu.memory_space<vmem>>, %arg6: memref<8x1xf32, #tpu.memory_space<vmem>>) attributes {dimension_semantics = [#tpu.dimension_semantics<parallel>, #tpu.dimension_semantics<arbitrary>], iteration_bounds = array<i64: 1, 1>, scalar_prefetch = 0 : i64, scratch_operands = 0 : i64, tpu.core_type = #tpu.core_type<tc>, window_params = [{transform_indices = @transform_0, window_bounds = array<i64: 8, 256>}, {transform_indices = @transform_1, window_bounds = array<i64: 8, 256>}, {transform_indices = @transform_2, window_bounds = array<i64: 8, 256>}, {transform_indices = @transform_3, window_bounds = array<i64: 8, 1>}, {transform_indices = @transform_4, window_bounds = array<i64: 8, 1>}]} {
    %c0_i32 = arith.constant 0 : i32
    %0 = arith.cmpi eq, %arg1, %c0_i32 : i32
    %1 = arith.extui %0 : i1 to i32
    %c0_i32_0 = arith.constant 0 : i32
    %2 = arith.cmpi ne, %1, %c0_i32_0 : i32
    scf.if %2 {
      %cst_15 = arith.constant 0.000000e+00 : f32
      %20 = vector.broadcast %cst_15 : f32 to vector<8x1xf32>
      %c0_16 = arith.constant 0 : index
      %c0_17 = arith.constant 0 : index
      %21 = vector.load %arg5[%c0_16, %c0_17] : memref<8x1xf32, #tpu.memory_space<vmem>>, vector<8x1xf32>
      tpu.vector_store %arg5[%c0_16, %c0_17], %20 {strides = array<i32>} : memref<8x1xf32, #tpu.memory_space<vmem>>, vector<8x1xf32>,
      %cst_18 = arith.constant 0.000000e+00 : f32
      %22 = vector.broadcast %cst_18 : f32 to vector<8x1xf32>
      %c0_19 = arith.constant 0 : index
      %c0_20 = arith.constant 0 : index
      %23 = vector.load %arg6[%c0_19, %c0_20] : memref<8x1xf32, #tpu.memory_space<vmem>>, vector<8x1xf32>
      tpu.vector_store %arg6[%c0_19, %c0_20], %22 {strides = array<i32>} : memref<8x1xf32, #tpu.memory_space<vmem>>, vector<8x1xf32>,
    } else {
    }
    %c0 = arith.constant 0 : index
    %c0_1 = arith.constant 0 : index
    %3 = vector.load %arg2[%c0, %c0_1] : memref<8x256xf32, #tpu.memory_space<vmem>>, vector<8x256xf32>
    %c0_2 = arith.constant 0 : index
    %c0_3 = arith.constant 0 : index
    %4 = vector.load %arg3[%c0_2, %c0_3] : memref<8x256xf32, #tpu.memory_space<vmem>>, vector<8x256xf32>
    %5 = arith.subf %3, %4 : vector<8x256xf32>
    %c0_4 = arith.constant 0 : index
    %c0_5 = arith.constant 0 : index
    %6 = vector.load %arg4[%c0_4, %c0_5] : memref<8x256xf32, #tpu.memory_space<vmem>>, vector<8x256xf32>
    %7 = arith.subf %3, %6 : vector<8x256xf32>
    %c0_6 = arith.constant 0 : index
    %c0_7 = arith.constant 0 : index
    %8 = vector.load %arg5[%c0_6, %c0_7] : memref<8x1xf32, #tpu.memory_space<vmem>>, vector<8x1xf32>
    %9 = arith.mulf %5, %5 : vector<8x256xf32>
    %cst = arith.constant dense<0.000000e+00> : vector<8xf32>
    %10 = vector.multi_reduction <add>, %9, %cst [1] : vector<8x256xf32> to vector<8xf32>
    %11 = vector.shape_cast %10 : vector<8xf32> to vector<8x1xf32>
    %12 = arith.addf %8, %11 : vector<8x1xf32>
    %c0_8 = arith.constant 0 : index
    %c0_9 = arith.constant 0 : index
    %13 = vector.load %arg5[%c0_8, %c0_9] : memref<8x1xf32, #tpu.memory_space<vmem>>, vector<8x1xf32>
    tpu.vector_store %arg5[%c0_8, %c0_9], %12 {strides = array<i32>} : memref<8x1xf32, #tpu.memory_space<vmem>>, vector<8x1xf32>,
    %c0_10 = arith.constant 0 : index
    %c0_11 = arith.constant 0 : index
    %14 = vector.load %arg6[%c0_10, %c0_11] : memref<8x1xf32, #tpu.memory_space<vmem>>, vector<8x1xf32>
    %15 = arith.mulf %7, %7 : vector<8x256xf32>
    %cst_12 = arith.constant dense<0.000000e+00> : vector<8xf32>
    %16 = vector.multi_reduction <add>, %15, %cst_12 [1] : vector<8x256xf32> to vector<8xf32>
    %17 = vector.shape_cast %16 : vector<8xf32> to vector<8x1xf32>
    %18 = arith.addf %14, %17 : vector<8x1xf32>
    %c0_13 = arith.constant 0 : index
    %c0_14 = arith.constant 0 : index
    %19 = vector.load %arg6[%c0_13, %c0_14] : memref<8x1xf32, #tpu.memory_space<vmem>>, vector<8x1xf32>
    tpu.vector_store %arg6[%c0_13, %c0_14], %18 {strides = array<i32>} : memref<8x1xf32, #tpu.memory_space<vmem>>, vector<8x1xf32>,
    return
  }
  func.func @transform_0(%arg0: i32, %arg1: i32) -> (i32, i32) {
    %c0_i32 = arith.constant 0 : i32
    return %arg0, %arg1 : i32, i32
  }
  func.func @transform_1(%arg0: i32, %arg1: i32) -> (i32, i32) {
    %c0_i32 = arith.constant 0 : i32
    return %arg0, %arg1 : i32, i32
  }
  func.func @transform_2(%arg0: i32, %arg1: i32) -> (i32, i32) {
    %c0_i32 = arith.constant 0 : i32
    return %arg0, %arg1 : i32, i32
  }
  func.func @transform_3(%arg0: i32, %arg1: i32) -> (i32, i32) {
    %c0_i32 = arith.constant 0 : i32
    %c0_i32_0 = arith.constant 0 : i32
    return %arg0, %c0_i32 : i32, i32
  }
  func.func @transform_4(%arg0: i32, %arg1: i32) -> (i32, i32) {
    %c0_i32 = arith.constant 0 : i32
    %c0_i32_0 = arith.constant 0 : i32
    return %arg0, %c0_i32 : i32, i32
  }
}

</mosaic_0001>

<bundles_post_ra>
// kernel: tpu_custom_call.1
= control target key start
LH: loop header
LB: loop body
LE: loop exit
PB: predicated region body
PF: predicated region fallthrough
CT: control target
= control target key end

     0   :  { %10 = vsyncpa [#allocation3], 0  ;;  %s241_s0 = inlined_call_operand.hbm [shape: f32[8,256], index: 0, kind: input, shape index: {}]   ;;  %s242_s1 = inlined_call_operand.hbm [shape: f32[8,256], index: 1, kind: input, shape index: {}]   ;;  %s243_s2 = inlined_call_operand.hbm [shape: f32[8,256], index: 2, kind: input, shape index: {}]   ;;  %s244_s3 = inlined_call_operand.vmem [shape: f32[8,1], index: 3, kind: output, shape index: {0}]   ;;  %s245_s4 = inlined_call_operand.vmem [shape: f32[8,1], index: 4, kind: output, shape index: {1}]  }
   0x1   :  { %11 = vsyncpa [#allocation5], 0  ;;  %s28_s17 = sshll.u32 %s242_s1, 4  ;;  %s181_s18 = smov [#allocation4]   ;;  %s29_s17 = int_to_ptr.hbm [resolvable:$true] %s28_s17 }
   0x2   :  { %s30_s19 = sshll.u32 %s181_s18, 4  ;;  %s17_s22 = sshll.u32 %s241_s0, 4  ;;  %s31_s19 = int_to_ptr.vmem [resolvable:$true] %s30_s19  ;;  %s18_s22 = int_to_ptr.hbm [resolvable:$true] %s17_s22 }
   0x3   :  { %33 = dma.hbm_to_vmem [thread:$0]  %s29_s17, 256, %s31_s19, [#allocation5]  }
   0x4   :  { %s182_s23 = smov [#allocation2]   ;;  %s39_s27 = sshll.u32 %s243_s2, 4  ;;  %s40_s27 = int_to_ptr.hbm [resolvable:$true] %s39_s27 }
   0x5   :  { %s19_s24 = sshll.u32 %s182_s23, 4  ;;  %s183_s1 = smov [#allocation6]   ;;  %s20_s24 = int_to_ptr.vmem [resolvable:$true] %s19_s24 }
   0x6   :  { %22 = dma.hbm_to_vmem [thread:$0]  %s18_s22, 256, %s20_s24, [#allocation3]  }
   0x7   :  { %s41_s28 = sshll.u32 %s183_s1, 4  ;;  %s42_s28 = int_to_ptr.vmem [resolvable:$true] %s41_s28 }
   0x8   :  { %44 = dma.hbm_to_vmem [thread:$0]  %s40_s27, 256, %s42_s28, [#allocation5]  }
   0x9   :  { %177 = dma.done.wait [#allocation3], 256  }
   0xa   :  { %178 = vsyncadd [#allocation3], 4294967040 }
   0xb   :  { %179 = dma.done.wait [#allocation5], 512  }
   0xc   :  { %180 = vsyncadd [#allocation5], 4294966784  ;;  %vm61_vm0 = vcmask 7168   ;;  %v184_v0 = vmov 0.0   ;;  %v64_v1 = vld [vmem:[#allocation2] sm:$0xff]  ;;  %v65_v2 = vld [vmem:[#allocation2 + $0x8] sm:$0xff] }
   0xd   :  { %62 = vst.msk [vmem:[%s244_s3] sm:$0xff] %vm61_vm0, %v184_v0  ;;  %v66_v3 = vld [vmem:[#allocation4] sm:$0xff]  ;;  %v67_v4 = vld [vmem:[#allocation4 + $0x8] sm:$0xff]  ;;  %v70_v6 = vld [vmem:[#allocation6] sm:$0xff] }
   0xe   :  { %63 = vst.msk [vmem:[%s245_s4] sm:$0xff] %vm61_vm0, %v184_v0  ;;  %v68_v5 = vsub.f32 %v64_v1, %v66_v3  ;;  %v71_v7 = vld [vmem:[#allocation6 + $0x8] sm:$0xff]  ;;  %v69_v8 = vsub.f32 %v65_v2, %v67_v4  ;;  %v72_v11 = vsub.f32 %v64_v1, %v70_v6 }
   0xf   :  { %v73_v12 = vsub.f32 %v65_v2, %v71_v7 }
  0x10   :  { %v75_v9 = vmul.f32 %v68_v5, %v68_v5  ;;  %v76_v10 = vmul.f32 %v69_v8, %v69_v8  ;;  %v84_v14 = vmul.f32 %v72_v11, %v72_v11 }
  0x11   :  { %v85_v15 = vmul.f32 %v73_v12, %v73_v12 }
  0x12   :  { %v77_v13 = vadd.f32 %v76_v10, %v75_v9 }
  0x13   :  { %v86_v16 = vadd.f32 %v85_v15, %v84_v14 }
  0x14   :  { %78 = vadd.xlane.f32.xlu0 %v77_v13  ;;  %v74_v17 = vld [vmem:[%s244_s3] sm:$0xff] }
  0x15   :  { %v83_v20 = vld [vmem:[%s245_s4] sm:$0xff] }
  0x1c   :  { %87 = vadd.xlane.f32.xlu0 %v86_v16 }
  0x87   :  { %v79_v18 = vpop.xlane.xlu0 %78 }
  0x88   :  { %v80_v19 = vadd.f32 %v79_v18, %v74_v17 }
  0x8a   :  { %82 = vst.msk [vmem:[%s244_s3] sm:$0xff] %vm61_vm0, %v80_v19 }
  0x8f   :  { %v88_v21 = vpop.xlane.xlu0 %87 }
  0x90   :  { %v89_v22 = vadd.f32 %v88_v21, %v83_v20 }
  0x92   :  { %90 = vst.msk [vmem:[%s245_s4] sm:$0xff] %vm61_vm0, %v89_v22 }
  0x93   :  { %99 = vsyncpa [#allocation3], 1 }
  0x94   :  { %100 = vsyncpa [#allocation5], 1 }

</bundles_post_ra>
